<compile_context>
chip_gen: v7x
topology: tpu7x:2x2x1
jax: 0.10.0
libtpu: 0.0.40
codegen_flags: <defaults>
</compile_context>

<pallas_src>
import math

import jax
import jax.numpy as jnp
from jax import lax
from jax.experimental import pallas as pl
from jax.experimental.pallas import tpu as pltpu

_HIGHEST = jax.lax.Precision.HIGHEST


# ---------------------------------------------------------------------------
# Fused kernel
# ---------------------------------------------------------------------------
def fused_gcn_kernel(adj_ref, x_ref, mask_ref, w_ref, b_ref, out_ref):
    # adj_ref:  (1, N, N)     int8  ({0,1} adjacency, self loops already set)
    # x_ref:    (1, N, F_in)  f32
    # mask_ref: (1, N, 1)     f32
    # w_ref:    (F_in, F_out) f32
    # b_ref:    (1, F_out)    f32
    # out_ref:  (1, N, F_out) f32
    adj = adj_ref[0].astype(jnp.bfloat16)                 # (N, N); exact for {0,1}

    # Row degrees: bf16 row sum is exact for a 0/1 adjacency with N <= 256.
    deg = jnp.maximum(
        jnp.sum(adj, axis=-1, keepdims=True).astype(jnp.float32),
        jnp.float32(1.0))                                 # (N, 1)
    dinv = lax.rsqrt(deg)                                 # (N, 1) = D^-1/2

    # Projection X @ W: tiny (N,F_in)@(F_in,F_out); HIGHEST keeps f32 parity
    # with the reference and stays entirely VMEM-resident.
    xw = jnp.dot(x_ref[0], w_ref[...],
                 preferred_element_type=jnp.float32, precision=_HIGHEST)

    # D^-1/2 A D^-1/2 XW == dinv_row * (A @ (dinv_col * XW)); fold dinv_col
    # into xw once per batch element.
    rhs = dinv * xw                                       # (N, F_out) f32

    # bf16 adjacency straight to the MXU; 2-pass hi/lo split of rhs keeps
    # ~f32 accuracy (adj is exactly representable in bf16).
    rhs_hi = rhs.astype(jnp.bfloat16)
    rhs_lo = (rhs - rhs_hi.astype(jnp.float32)).astype(jnp.bfloat16)
    msg = (jnp.dot(adj, rhs_hi, preferred_element_type=jnp.float32)
           + jnp.dot(adj, rhs_lo, preferred_element_type=jnp.float32))

    mask = mask_ref[0]                                    # (N, 1)
    scale = dinv * mask                                   # fold mask into row scale
    out_ref[0] = (scale * msg + mask * b_ref[...]).astype(out_ref.dtype)


# ---------------------------------------------------------------------------
# VMEM accounting / compiler params
# ---------------------------------------------------------------------------
def _vmem_step_bytes(n, f_in, f_out):
    """Per-grid-step VMEM, counting 2x (double buffering) for EVERY operand."""
    io = 2 * (n * n * 1            # adj (int8)
              + n * f_in * 4       # x
              + n * 4              # feature mask
              + f_in * f_out * 4   # weight
              + f_out * 4          # bias
              + n * f_out * 4)     # out
    # in-kernel live values: bf16 adj, xw/rhs/msg f32, rhs hi/lo bf16, deg/dinv
    live = n * n * 2 + 3 * n * f_out * 4 + 2 * n * f_out * 2 + 2 * n * 4
    return io + live


def _compiler_params(step_bytes):
    try:
        phys = int(pltpu.get_tpu_info().vmem_capacity_bytes)
    except Exception:
        phys = 64 * 2**20          # conservative fallback: v7x physical VMEM
    budget = int(phys * 0.75)      # generation-aware (≈96 MiB v5e/v6e, 48 MiB v7x)
    if step_bytes > budget:
        # TODO(synk): add a row-tiled fallback path for very large N.
        raise ValueError(
            f"per-step VMEM {step_bytes} B exceeds budget {budget} B; "
            "row-tile the adjacency for this problem size")
    kw = dict(dimension_semantics=("parallel",))
    if step_bytes > 16 * 2**20:    # raise the scoped limit only when needed
        kw["vmem_limit_bytes"] = min(max(step_bytes + (4 << 20), 32 * 2**20),
                                     budget)
    return pltpu.CompilerParams(**kw)


# ---------------------------------------------------------------------------
# Wrapper
# ---------------------------------------------------------------------------
def gcn_layer(adj, x, feature_mask, weight, bias):
    B, N, _ = adj.shape
    F_in, F_out = weight.shape
    assert N <= 256, "bf16 row-sum degree computation assumes N <= 256"

    # Self loops set once here (fuses with the dtype cast that already reads /
    # writes adj).  NOTE: int8 adjacency storage is only exact for {0,1}
    # adjacencies; a weighted adjacency would be silently degraded.
    idx = jnp.arange(N)
    adj_i8 = adj.at[:, idx, idx].set(1.0).astype(jnp.int8)

    x_f32 = x.astype(jnp.float32)
    mask3 = feature_mask.reshape(B, N, 1).astype(jnp.float32)
    w_f32 = weight.astype(jnp.float32)
    bias2 = bias.reshape(1, F_out).astype(jnp.float32)

    step_bytes = _vmem_step_bytes(N, F_in, F_out)

    out = pl.pallas_call(
        fused_gcn_kernel,
        out_shape=jax.ShapeDtypeStruct((B, N, F_out), jnp.float32),
        grid_spec=pltpu.PrefetchScalarGridSpec(
            num_scalar_prefetch=0,
            grid=(B,),
            in_specs=[
                pl.BlockSpec((1, N, N), lambda b: (b, 0, 0)),     # adj (int8)
                pl.BlockSpec((1, N, F_in), lambda b: (b, 0, 0)),  # x
                pl.BlockSpec((1, N, 1), lambda b: (b, 0, 0)),     # feature mask
                pl.BlockSpec((F_in, F_out), lambda b: (0, 0)),    # weight
                pl.BlockSpec((1, F_out), lambda b: (0, 0)),       # bias
            ],
            # F_out=128 -> lane-dense output stores.
            out_specs=pl.BlockSpec((1, N, F_out), lambda b: (b, 0, 0)),
        ),
        compiler_params=_compiler_params(step_bytes),
    )(adj_i8, x_f32, mask3, w_f32, bias2)
    return out


# ---------------------------------------------------------------------------
# Pure-JAX reference mirroring the PyTorch forward
# ---------------------------------------------------------------------------
def gcn_layer_ref(adj, x, feature_mask, weight, bias):
    B, N, _ = adj.shape
    idx = jnp.arange(N)
    adj = adj.at[:, idx, idx].set(1.0)
    xw = jnp.matmul(x, weight, precision=_HIGHEST)
    deg_inv_sqrt = jnp.maximum(adj.sum(-1), 1.0) ** -0.5
    adj_n = deg_inv_sqrt[:, :, None] * adj * deg_inv_sqrt[:, None, :]
    out = jnp.matmul(adj_n, xw, precision=_HIGHEST)
    out = out + bias.reshape(1, 1, -1)
    out = out * feature_mask[:, :, None]
    return out


if __name__ == "__main__":
    # Shapes consistent with Encoder's GNN: max_node_num=96 graph nodes,
    # f_hidden=64 input features, f_out=128 (transformer d_model) output.
    B, N, F_in, F_out = 2, 96, 64, 128

    key = jax.random.PRNGKey(0)
    k_adj, k_x, k_mask, k_w, k_b = jax.random.split(key, 5)

    adj = (jax.random.uniform(k_adj, (B, N, N)) > 0.7).astype(jnp.float32)
    x = jax.random.normal(k_x, (B, N, F_in), dtype=jnp.float32)
    feature_mask = (jax.random.uniform(k_mask, (B, N)) > 0.2).astype(jnp.float32)

    # parameter init matching GCN_layer.__init__ semantics
    stdv = 1.0 / math.sqrt(F_out)
    weight = jax.random.uniform(k_w, (F_in, F_out), jnp.float32, -stdv, stdv)
    bias = jax.random.uniform(k_b, (1, 1, F_out), jnp.float32, -stdv, stdv)

    out = gcn_layer(adj, x, feature_mask, weight, bias)
    out = jax.block_until_ready(out)

    ref = gcn_layer_ref(adj, x, feature_mask, weight, bias)
    assert out.shape == (B, N, F_out)
    max_err = jnp.max(jnp.abs(out - ref))
    assert jnp.allclose(out, ref, atol=1e-4, rtol=1e-4), \
        f"mismatch vs reference, max abs err {max_err}"

    print("KERNEL_OK")
</pallas_src>

<mosaic_0001>
module attributes {stable_mosaic.version = 11 : i64} {
  func.func @fused_gcn_kernel(%arg0: i32, %arg1: memref<1x96x96xi8, #tpu.memory_space<vmem>>, %arg2: memref<1x96x64xf32, #tpu.memory_space<vmem>>, %arg3: memref<1x96x1xf32, #tpu.memory_space<vmem>>, %arg4: memref<64x128xf32, #tpu.memory_space<vmem>>, %arg5: memref<1x128xf32, #tpu.memory_space<vmem>>, %arg6: memref<1x96x128xf32, #tpu.memory_space<vmem>>) attributes {dimension_semantics = [#tpu.dimension_semantics<parallel>], iteration_bounds = array<i64: 2>, scalar_prefetch = 0 : i64, scratch_operands = 0 : i64, tpu.core_type = #tpu.core_type<tc>, window_params = [{transform_indices = @transform_0, window_bounds = array<i64: 1, 96, 96>}, {transform_indices = @transform_1, window_bounds = array<i64: 1, 96, 64>}, {transform_indices = @transform_2, window_bounds = array<i64: 1, 96, 1>}, {pipeline_mode = #tpu.pipeline_mode<synchronous>, transform_indices = @transform_3, window_bounds = array<i64: 64, 128>}, {pipeline_mode = #tpu.pipeline_mode<synchronous>, transform_indices = @transform_4, window_bounds = array<i64: 1, 128>}, {transform_indices = @transform_5, window_bounds = array<i64: 1, 96, 128>}]} {
    %c0 = arith.constant 0 : index
    %c0_0 = arith.constant 0 : index
    %c0_1 = arith.constant 0 : index
    %0 = vector.load %arg1[%c0, %c0_0, %c0_1] : memref<1x96x96xi8, #tpu.memory_space<vmem>>, vector<1x96x96xi8>
    %1 = vector.shape_cast %0 : vector<1x96x96xi8> to vector<96x96xi8>
    %2 = arith.sitofp %1 : vector<96x96xi8> to vector<96x96xbf16>
    %3 = arith.extf %2 : vector<96x96xbf16> to vector<96x96xf32>
    %cst = arith.constant dense<0.000000e+00> : vector<96xf32>
    %4 = vector.multi_reduction <add>, %3, %cst [1] : vector<96x96xf32> to vector<96xf32>
    %5 = vector.shape_cast %4 : vector<96xf32> to vector<96x1xf32>
    %6 = arith.truncf %5 : vector<96x1xf32> to vector<96x1xbf16>
    %7 = arith.extf %6 : vector<96x1xbf16> to vector<96x1xf32>
    %cst_2 = arith.constant 1.000000e+00 : f32
    %8 = vector.broadcast %cst_2 : f32 to vector<96x1xf32>
    %9 = arith.maximumf %7, %8 : vector<96x1xf32>
    %10 = math.rsqrt %9 : vector<96x1xf32>
    %c0_3 = arith.constant 0 : index
    %c0_4 = arith.constant 0 : index
    %c0_5 = arith.constant 0 : index
    %11 = vector.load %arg2[%c0_3, %c0_4, %c0_5] : memref<1x96x64xf32, #tpu.memory_space<vmem>>, vector<1x96x64xf32>
    %12 = vector.shape_cast %11 : vector<1x96x64xf32> to vector<96x64xf32>
    %c0_6 = arith.constant 0 : index
    %c0_7 = arith.constant 0 : index
    %13 = vector.load %arg4[%c0_6, %c0_7] : memref<64x128xf32, #tpu.memory_space<vmem>>, vector<64x128xf32>
    %cst_8 = arith.constant dense<0.000000e+00> : vector<96x128xf32>
    %14 = tpu.matmul %12, %13, %cst_8 {dimension_numbers = #tpu.dot_dimension_numbers<[1], [0], [0], [1], [0, 0, 1, 1], [], []>, precision = #tpu.contract_precision<fp32>} : vector<96x64xf32>, vector<64x128xf32>, vector<96x128xf32> -> vector<96x128xf32>
    %15 = vector.broadcast %10 : vector<96x1xf32> to vector<96x128xf32>
    %16 = arith.mulf %15, %14 : vector<96x128xf32>
    %17 = arith.truncf %16 : vector<96x128xf32> to vector<96x128xbf16>
    %18 = arith.extf %17 : vector<96x128xbf16> to vector<96x128xf32>
    %19 = arith.subf %16, %18 : vector<96x128xf32>
    %20 = arith.truncf %19 : vector<96x128xf32> to vector<96x128xbf16>
    %cst_9 = arith.constant dense<0.000000e+00> : vector<96x128xf32>
    %21 = tpu.matmul %2, %17, %cst_9 {dimension_numbers = #tpu.dot_dimension_numbers<[1], [0], [0], [1], [0, 0, 1, 1], [], []>} : vector<96x96xbf16>, vector<96x128xbf16>, vector<96x128xf32> -> vector<96x128xf32>
    %cst_10 = arith.constant dense<0.000000e+00> : vector<96x128xf32>
    %22 = tpu.matmul %2, %20, %cst_10 {dimension_numbers = #tpu.dot_dimension_numbers<[1], [0], [0], [1], [0, 0, 1, 1], [], []>} : vector<96x96xbf16>, vector<96x128xbf16>, vector<96x128xf32> -> vector<96x128xf32>
    %23 = arith.addf %21, %22 : vector<96x128xf32>
    %c0_11 = arith.constant 0 : index
    %c0_12 = arith.constant 0 : index
    %c0_13 = arith.constant 0 : index
    %24 = vector.load %arg3[%c0_11, %c0_12, %c0_13] : memref<1x96x1xf32, #tpu.memory_space<vmem>>, vector<1x96x1xf32>
    %25 = vector.shape_cast %24 : vector<1x96x1xf32> to vector<96x1xf32>
    %26 = arith.mulf %10, %25 : vector<96x1xf32>
    %27 = vector.broadcast %26 : vector<96x1xf32> to vector<96x128xf32>
    %28 = arith.mulf %27, %23 : vector<96x128xf32>
    %c0_14 = arith.constant 0 : index
    %c0_15 = arith.constant 0 : index
    %29 = vector.load %arg5[%c0_14, %c0_15] : memref<1x128xf32, #tpu.memory_space<vmem>>, vector<1x128xf32>
    %30 = vector.broadcast %25 : vector<96x1xf32> to vector<96x128xf32>
    %31 = vector.broadcast %29 : vector<1x128xf32> to vector<96x128xf32>
    %32 = arith.mulf %30, %31 : vector<96x128xf32>
    %33 = arith.addf %28, %32 : vector<96x128xf32>
    %c0_16 = arith.constant 0 : index
    %c0_17 = arith.constant 0 : index
    %c0_18 = arith.constant 0 : index
    %34 = vector.load %arg6[%c0_16, %c0_17, %c0_18] : memref<1x96x128xf32, #tpu.memory_space<vmem>>, vector<1x96x128xf32>
    %35 = vector.shape_cast %34 : vector<1x96x128xf32> to vector<96x128xf32>
    %36 = vector.shape_cast %33 : vector<96x128xf32> to vector<1x96x128xf32>
    tpu.vector_store %arg6[%c0_16, %c0_17, %c0_18], %36 {strides = array<i32>} : memref<1x96x128xf32, #tpu.memory_space<vmem>>, vector<1x96x128xf32>,
    return
  }
  func.func @transform_0(%arg0: i32) -> (i32, i32, i32) {
    %c0_i32 = arith.constant 0 : i32
    %c0_i32_0 = arith.constant 0 : i32
    %c0_i32_1 = arith.constant 0 : i32
    return %arg0, %c0_i32, %c0_i32_0 : i32, i32, i32
  }
  func.func @transform_1(%arg0: i32) -> (i32, i32, i32) {
    %c0_i32 = arith.constant 0 : i32
    %c0_i32_0 = arith.constant 0 : i32
    %c0_i32_1 = arith.constant 0 : i32
    return %arg0, %c0_i32, %c0_i32_0 : i32, i32, i32
  }
  func.func @transform_2(%arg0: i32) -> (i32, i32, i32) {
    %c0_i32 = arith.constant 0 : i32
    %c0_i32_0 = arith.constant 0 : i32
    %c0_i32_1 = arith.constant 0 : i32
    return %arg0, %c0_i32, %c0_i32_0 : i32, i32, i32
  }
  func.func @transform_3(%arg0: i32) -> (i32, i32) {
    %c0_i32 = arith.constant 0 : i32
    %c0_i32_0 = arith.constant 0 : i32
    %c0_i32_1 = arith.constant 0 : i32
    return %c0_i32, %c0_i32_0 : i32, i32
  }
  func.func @transform_4(%arg0: i32) -> (i32, i32) {
    %c0_i32 = arith.constant 0 : i32
    %c0_i32_0 = arith.constant 0 : i32
    %c0_i32_1 = arith.constant 0 : i32
    return %c0_i32, %c0_i32_0 : i32, i32
  }
  func.func @transform_5(%arg0: i32) -> (i32, i32, i32) {
    %c0_i32 = arith.constant 0 : i32
    %c0_i32_0 = arith.constant 0 : i32
    %c0_i32_1 = arith.constant 0 : i32
    return %arg0, %c0_i32, %c0_i32_0 : i32, i32, i32
  }
}

</mosaic_0001>

<bundles_post_ra>
// kernel: tpu_custom_call.1
= control target key start
LH: loop header
LB: loop body
LE: loop exit
PB: predicated region body
PF: predicated region fallthrough
CT: control target
= control target key end

     0   :  { %10 = vsyncpa [#allocation3], 0  ;;  %s3379_s0 = inlined_call_operand.vmem [shape: s8[2,96,96], index: 0, kind: input, shape index: {}]   ;;  %s3380_s1 = inlined_call_operand.vmem [shape: f32[2,96,64], index: 1, kind: input, shape index: {}]   ;;  %s3381_s2 = inlined_call_operand.vmem [shape: f32[2,96,1], index: 2, kind: input, shape index: {}]   ;;  %s3382_s3 = inlined_call_operand.vmem [shape: f32[64,128], index: 3, kind: input, shape index: {}]   ;;  %s3383_s4 = inlined_call_operand.vmem [shape: f32[1,128], index: 4, kind: input, shape index: {}]   ;;  %s3384_s5 = inlined_call_operand.hbm [shape: f32[2,96,128], index: 5, kind: output, shape index: {}]  }
   0x1   :  { %12 = vsyncpa [#allocation3 + $0x1], 0  ;;  %s2715_s18 = smov 0   ;;  %s2717_s19 = smov 0  }
   0x2   :  { %s2719_s20 = smov 0   ;;  %s2721_s21 = smov 0  }
   0x3 LB: > { %s2736_s22 = sadd.s32 4294967295, %s2679_s21   ;;  %s1958_s23 = sadd.s32 4294967294, %s2679_s21   ;;  %s2679_s21 = sphi %s2721_s21, %s3414_s21   ;;  %s2675_s20 = sphi %s2719_s20, %s3413_s20   ;;  %s2671_s19 = sphi %s2717_s19, %s3412_s19   ;;  %s2667_s18 = sphi %s2715_s18, %s3411_s18  }
   0x4   : > { %s2740_s24 = sadd.s32 1, %s2679_s21   ;;  %s145_s25 = sadd.s32 1, %s2675_s20 }
   0x5   : > { %s142_s26 = ssub.s32 %s2679_s21, %s2740_s24  ;;  %p155_p0 = scmp.ne.s32.totalorder %s2675_s20, %s2671_s19 }
   0x6   : > { %p143_p1 = scmp.eq.s32.totalorder %s142_s26, 0  ;;  %p156_p2 = scmp.eq.s32.totalorder %s2736_s22, 1 }
   0x7   : > { %p161_p3 = scmp.ne.s32.totalorder %s2671_s19, %s2667_s18  ;;  %p162_p4 = scmp.eq.s32.totalorder %s1958_s23, 1 }
   0x8   : > { %s2751_s27 = scalar_select %p143_p1, %s2675_s20, %s145_s25  }
   0x9   : > { %p2753_p5 = por %p156_p2, %p155_p0  ;;  %p2757_p6 = por %p162_p4, %p161_p3 }
   0xa   : > { %p1961_p7 = scmp.ge.s32.totalorder %s2679_s21, 1  ;;  %p210_p8 = scmp.lt.s32.totalorder %s2679_s21, 3 }
   0xc   : > { %p211_p9 = pnand %p1961_p7, %p210_p8 }
   0xd   : > { %v376_v0 = vld [vmem:[%s3382_s3] sm:$0xff] (!%p211_p9)  ;;  %v377_v1 = vld [vmem:[%s3382_s3 + $0x8] sm:$0xff] (!%p211_p9)  ;;  %v378_v2 = vld [vmem:[%s3382_s3 + $0x10] sm:$0xff] (!%p211_p9)  ;;  %p248_p10 = scmp.lt.s32.totalorder (!%p211_p9), %s2736_s22, 1  ;;  %vm384_vm0 = vcmask (!%p211_p9), 523264   ;;  %vm285_vm1 = vcmask (!%p211_p9), 785408  }
   0xe   : > { %214 = sbr.rel (%p211_p9) target bundleno = 632 (0x278), region = 40  ;;  %v422_v3 = vand.u32 (!%p211_p9), 4294901760, %v376_v0  ;;  %v425_v4 = vand.u32 (!%p211_p9), 4294901760, %v377_v1  ;;  %v379_v5 = vld [vmem:[%s3382_s3 + $0x18] sm:$0xff] (!%p211_p9)  ;;  %v428_v6 = vand.u32 (!%p211_p9), 4294901760, %v378_v2  ;;  %v380_v7 = vld [vmem:[%s3382_s3 + $0x20] sm:$0xff] (!%p211_p9) }
   0xf   : > { %v381_v8 = vld [vmem:[%s3382_s3 + $0x28] sm:$0xff] (!%p211_p9)  ;;  %v431_v9 = vand.u32 (!%p211_p9), 4294901760, %v379_v5  ;;  %v434_v10 = vand.u32 (!%p211_p9), 4294901760, %v380_v7  ;;  %v382_v12 = vld [vmem:[%s3382_s3 + $0x30] sm:$0xff] (!%p211_p9)  ;;  %v383_v13 = vld [vmem:[%s3382_s3 + $0x38] sm:$0xff] (!%p211_p9)  ;;  %s245_s17 = sand.u32 (!%p211_p9), 1, %s2671_s19  }
  0x10   : > { %v437_v11 = vand.u32 (!%p211_p9), 4294901760, %v381_v8  ;;  %v2791_v14 = vpack.c.bf16 (!%p211_p9), %v425_v4, %v422_v3  ;;  %v2793_v15 = vsub.f32 (!%p211_p9), %v376_v0, %v422_v3  ;;  %v2795_v16 = vsub.f32 (!%p211_p9), %v377_v1, %v425_v4  ;;  %s2545_s26 = smul.u32 (!%p211_p9), 96, %s245_s17  ;;  %s2682_s12 = smov (!%p211_p9), [#allocation2]  }
  0x11   : > { %v2797_v17 = vsub.f32 (!%p211_p9), %v378_v2, %v428_v6  ;;  %v2799_v18 = vpack.c.bf16 (!%p211_p9), %v431_v9, %v428_v6  ;;  %v2801_v19 = vsub.f32 (!%p211_p9), %v379_v5, %v431_v9  ;;  %v2803_v20 = vsub.f32 (!%p211_p9), %v380_v7, %v434_v10 }
  0x12   : > { %v2409_v21 = vpack.c.bf16 (!%p211_p9), %v2795_v16, %v2793_v15  ;;  %v2808_v22 = vsub.f32 (!%p211_p9), %v381_v8, %v437_v11  ;;  %v440_v23 = vand.u32 (!%p211_p9), 4294901760, %v382_v12  ;;  %v443_v24 = vand.u32 (!%p211_p9), 4294901760, %v383_v13  ;;  %2378 = vmatprep.subr.bf16.mxu1 (!%p211_p9), %v2791_v14 }
  0x13   : > { %v2413_v25 = vpack.c.bf16 (!%p211_p9), %v2801_v19, %v2797_v17  ;;  %2380 = vmatpush3.bf16.msra.mxu1 (!%p211_p9), %v2791_v14  ;;  %v2821_v26 = vpack.c.bf16 (!%p211_p9), %v437_v11, %v434_v10  ;;  %v617_v30 = vand.u32 (!%p211_p9), 4294901760, %v2793_v15  ;;  %v624_v1 = vand.u32 (!%p211_p9), 4294901760, %v2795_v16 }
  0x14   : > { %2410 = vmatprep.subr.bf16.mxu0 (!%p211_p9), %v2409_v21  ;;  %v2417_v31 = vpack.c.bf16 (!%p211_p9), %v2808_v22, %v2803_v20  ;;  %2382 = vmatprep.subr.bf16.mxu1 (!%p211_p9), %v2799_v18  ;;  %v2836_v38 = vsub.f32 (!%p211_p9), %v382_v12, %v440_v23  ;;  %v2838_v39 = vsub.f32 (!%p211_p9), %v383_v13, %v443_v24  ;;  %v631_v2 = vand.u32 (!%p211_p9), 4294901760, %v2797_v17 }
  0x15   : > { %s2789_s30 = scalar_select %p248_p10, %s2736_s22, 1  ;;  %2412 = vmatpush3.bf16.msra.mxu0 %v2409_v21  ;;  %v2853_v50 = vpack.c.bf16 %v443_v24, %v440_v23 }
  0x16   : > { %2414 = vmatprep.subr.bf16.mxu0 %v2413_v25  ;;  %v2421_v58 = vpack.c.bf16 %v2838_v39, %v2836_v38 }
  0x17   : > { %s2547_s6 = smul.u32 96, %s2789_s30  ;;  %2384 = vmatpush3.bf16.msra.mxu1 %v2799_v18 }
  0x18   : > { %2386 = vmatprep.subr.bf16.mxu1 %v2821_v26  ;;  %s2546_s10 = smul.u32 24, %s2789_s30  ;;  %s3303_s30 = scalar_lea.vmem [#allocation2], %s2545_s26 }
  0x19   : > { %s2818_s9 = scalar_lea.vmem %s3380_s1, %s2547_s6  ;;  %2416 = vmatpush3.bf16.msra.mxu0 %v2413_v25  ;;  %s3133_s16 = scalar_lea.vmem %s3381_s2, %s2547_s6 }
  0x1a   : > { %v364_v27 = vld [vmem:[%s2818_s9] sm:$0xff]  ;;  %v365_v28 = vld [vmem:[%s2818_s9 + $0x8] sm:$0xff]  ;;  %v366_v29 = vld [vmem:[%s2818_s9 + $0x10] sm:$0xff]  ;;  %2418 = vmatprep.subr.bf16.mxu0 %v2417_v31  ;;  %s2980_s13 = scalar_lea.vmem %s3379_s0, %s2546_s10  ;;  %s2548_s6 = smul.u32 1536, %s2736_s22 }
  0x1b   : > { %v386_v32 = vsel %vm384_vm0, %v364_v27, 0  ;;  %v389_v33 = vsel %vm384_vm0, %v365_v28, 0  ;;  %v392_v34 = vsel %vm384_vm0, %v366_v29, 0  ;;  %v367_v35 = vld [vmem:[%s2818_s9 + $0x18] sm:$0xff]  ;;  %v368_v36 = vld [vmem:[%s2818_s9 + $0x20] sm:$0xff]  ;;  %v369_v37 = vld [vmem:[%s2818_s9 + $0x28] sm:$0xff]  ;;  %2388 = vmatpush3.bf16.msra.mxu1 %v2821_v26 }
  0x1c   : > { %v2840_v40 = vand.u32 4294901760, %v386_v32  ;;  %v2842_v41 = vand.u32 4294901760, %v389_v33  ;;  %v370_v42 = vld [vmem:[%s2818_s9 + $0x30] sm:$0xff]  ;;  %v371_v43 = vld [vmem:[%s2818_s9 + $0x38] sm:$0xff]  ;;  %v395_v44 = vsel %vm384_vm0, %v367_v35, 0  ;;  %v398_v45 = vsel %vm384_vm0, %v368_v36, 0  ;;  %2390 = vmatprep.subr.bf16.mxu1 %v2853_v50 }
  0x1d   : > { %v401_v46 = vsel %vm384_vm0, %v369_v37, 0  ;;  %v404_v47 = vsel %vm384_vm0, %v370_v42, 0  ;;  %v372_v48 = vld [vmem:[%s2818_s9 + $0x40] sm:$0xff]  ;;  %v373_v49 = vld [vmem:[%s2818_s9 + $0x48] sm:$0xff]  ;;  %v2858_v52 = vand.u32 4294901760, %v392_v34  ;;  %v2860_v53 = vand.u32 4294901760, %v395_v44  ;;  %2420 = vmatpush3.bf16.msra.mxu0 %v2417_v31 }
  0x1e   : > { %v2856_v51 = vsub.f32 %v386_v32, %v2840_v40  ;;  %v2863_v54 = vand.u32 4294901760, %v398_v45  ;;  %v2865_v55 = vand.u32 4294901760, %v401_v46  ;;  %v2867_v56 = vand.u32 4294901760, %v404_v47  ;;  %v374_v0 = vld [vmem:[%s2818_s9 + $0x50] sm:$0xff]  ;;  %v375_v7 = vld [vmem:[%s2818_s9 + $0x58] sm:$0xff]  ;;  %2422 = vmatprep.subr.bf16.mxu0 %v2421_v58  ;;  %s1872_s7 = sshll.u32 %s3303_s30, 4  ;;  %s3329_s9 = scalar_lea.hbm %s3384_s5, %s2548_s6  ;;  %s3331_s7 = int_to_ptr.vmem [resolvable:$true] %s1872_s7 }
  0x1f   : > { %v407_v57 = vsel %vm384_vm0, %v371_v43, 0  ;;  %v410_v60 = vsel %vm384_vm0, %v372_v48, 0  ;;  %v413_v61 = vsel %vm384_vm0, %v373_v49, 0  ;;  %v2878_v62 = vsub.f32 %v389_v33, %v2842_v41  ;;  %2392 = vmatpush3.bf16.msra.mxu1 %v2853_v50  ;;  %s3338_s10 = scalar_lea.sflag [#allocation3], %s245_s17  ;;  %s2617_s11 = scalar_lea.vmem %s3331_s7, 1536 }
  0x20   : > { %2209 = vmatprep.mubr.f32.mxu0 %v2856_v51  ;;  %v2873_v59 = vand.u32 4294901760, %v407_v57  ;;  %v2880_v63 = vand.u32 4294901760, %v410_v60  ;;  %v2887_v3 = vsub.f32 %v392_v34, %v2858_v52  ;;  %v2890_v4 = vsub.f32 %v395_v44, %v2860_v53  ;;  %p2618_p11 = scmp.ne.s32.totalorder %s3331_s7, %s2617_s11 }
  0x21   : > { %v2893_v5 = vsub.f32 %v398_v45, %v2863_v54  ;;  %v2896_v6 = vsub.f32 %v401_v46, %v2865_v55  ;;  %v2901_v8 = vsub.f32 %v404_v47, %v2867_v56  ;;  %v2906_v10 = vand.u32 4294901760, %v413_v61  ;;  %2424 = vmatpush3.bf16.msra.mxu0 %v2421_v58 }
  0x22   : > { %v2904_v9 = vsub.f32 %v407_v57, %v2873_v59  ;;  %v496_v11 = vand.u32 4294901760, %v2856_v51  ;;  %v416_v12 = vsel %vm384_vm0, %v374_v0, 0  ;;  %v506_v13 = vand.u32 4294901760, %v2878_v62  ;;  %2426 = vmatprep.subr.bf16.mxu0 %v2791_v14  ;;  %p2619_p12 = pnand %p2618_p11, %p2753_p5 }
  0x23   : > { %v3393_v21 = vand.u32 4294901760, %v2887_v3  ;;  %v3389_v23 = vand.u32 4294901760, %v2890_v4  ;;  %v2914_v24 = vsub.f32 %v410_v60, %v2880_v63  ;;  %v419_v25 = vsel %vm384_vm0, %v375_v7, 0 }
  0x24   : > { %v497_v27 = vsub.f32 %v2856_v51, %v496_v11  ;;  %v3388_v28 = vand.u32 4294901760, %v2893_v5  ;;  %v507_v29 = vsub.f32 %v2878_v62, %v506_v13  ;;  %v638_v33 = vand.u32 4294901760, %v2801_v19  ;;  %2210 = vmatmul.mubr.f32.vlgmr.msra.gmra.mrb[0].mxu0 %v2878_v62  ;;  %p2620_p13 = pneg %p2619_p12 }
  0x25   : > { %v517_v31 = vsub.f32 %v2887_v3, %v3393_v21  ;;  %v527_v32 = vsub.f32 %v2890_v4, %v3389_v23  ;;  %v2932_v34 = vand.u32 4294901760, %v416_v12  ;;  %v3387_v36 = vand.u32 4294901760, %v2896_v6  ;;  %2428 = vmatpush3.bf16.msra.mxu0 %v2791_v14  ;;  %2212 = vmatprep.mubr.f32.mxu0 %v2887_v3 }
  0x26   : > { %v498_v35 = vand.u32 4294901760, %v497_v27  ;;  %v618_v37 = vsub.f32 %v2793_v15, %v617_v30  ;;  %v2939_v42 = vand.u32 4294901760, %v419_v25  ;;  %v508_v43 = vand.u32 4294901760, %v507_v29  ;;  %2430 = vmatprep.subr.bf16.mxu0 %v2799_v18 }
  0x27   : > { %v518_v44 = vand.u32 4294901760, %v517_v31  ;;  %v537_v45 = vsub.f32 %v2893_v5, %v3388_v28  ;;  %v528_v46 = vand.u32 4294901760, %v527_v32  ;;  %v547_v47 = vsub.f32 %v2896_v6, %v3387_v36 }
  0x28   : > { %2141 = vmatprep.mubr.f32.mxu1 %v498_v35  ;;  %v619_v48 = vand.u32 4294901760, %v618_v37  ;;  %v625_v49 = vsub.f32 %v2795_v16, %v624_v1  ;;  %v3385_v57 = vand.u32 4294901760, %v2901_v8  ;;  %v3386_v58 = vand.u32 4294901760, %v2904_v9  ;;  %2213 = vmatmul.mubr.f32.gmra.mrb[2].mxu0 %v2890_v4 }
  0x29   : > { %2142 = vmatmul.mubr.f32.vlgmr.msra.gmra.mrb[0].mxu1 %v508_v43  ;;  %v632_v60 = vsub.f32 %v2797_v17, %v631_v2  ;;  %v639_v0 = vsub.f32 %v2801_v19, %v638_v33  ;;  %v2963_v7 = vsub.f32 %v413_v61, %v2906_v10  ;;  %v3390_v29 = vand.u32 4294901760, %v2803_v20  ;;  %2215 = vmatprep.mubr.f32.mxu0 %v2893_v5 }
  0x2a   : > { %v626_v27 = vand.u32 4294901760, %v625_v49  ;;  %v3391_v31 = vand.u32 4294901760, %v2808_v22  ;;  %v2969_v32 = vsub.f32 %v416_v12, %v2932_v34  ;;  %2144 = vmatprep.mubr.f32.mxu1 %v518_v44  ;;  %v538_v35 = vand.u32 4294901760, %v537_v45  ;;  %2432 = vmatpush3.bf16.msra.mxu0 %v2799_v18 }
  0x2b   : > { %v557_v37 = vsub.f32 %v2901_v8, %v3385_v57  ;;  %v567_v61 = vsub.f32 %v2904_v9, %v3386_v58  ;;  %v633_v49 = vand.u32 4294901760, %v632_v60  ;;  %v640_v12 = vand.u32 4294901760, %v639_v0  ;;  %2434 = vmatprep.subr.bf16.mxu0 %v2821_v26 }
  0x2c   : > { %v2393_v43 = vpack.c.bf16 %v626_v27, %v619_v48  ;;  %v3392_v44 = vand.u32 4294901760, %v2914_v24  ;;  %v548_v45 = vand.u32 4294901760, %v547_v47  ;;  %v3395_v57 = vand.u32 4294901760, %v2963_v7  ;;  %v264_v47 = vld [vmem:[%s2980_s13] sm:$0xff]  ;;  %2216 = vmatmul.mubr.f32.gmra.mrb[4].mxu0 %v2896_v6 }
  0x2d   : > { %2145 = vmatmul.mubr.f32.gmra.mrb[2].mxu1 %v528_v46  ;;  %v646_v58 = vsub.f32 %v2803_v20, %v3390_v29  ;;  %v2991_v48 = vsub.f32 %v419_v25, %v2939_v42  ;;  %v653_v60 = vsub.f32 %v2808_v22, %v3391_v31  ;;  %v3394_v46 = vand.u32 4294901760, %v2969_v32  ;;  %2218 = vmatprep.mubr.f32.mxu0 %v2901_v8 }
  0x2e   : > { %2147 = vmatprep.mubr.f32.mxu1 %v538_v35  ;;  %v558_v0 = vand.u32 4294901760, %v557_v37  ;;  %v577_v27 = vsub.f32 %v2914_v24, %v3392_v44  ;;  %v3396_v36 = vand.u32 4294901760, %v2836_v38  ;;  %v666_v25 = vand.u32 4294901760, %v2838_v39  ;;  %2394 = vmatprep.subr.bf16.mxu1 %v2393_v43 }
  0x2f   : > { %v568_v28 = vand.u32 4294901760, %v567_v61  ;;  %v2397_v23 = vpack.c.bf16 %v640_v12, %v633_v49  ;;  %v647_v29 = vand.u32 4294901760, %v646_v58  ;;  %v654_v31 = vand.u32 4294901760, %v653_v60  ;;  %2436 = vmatpush3.bf16.msra.mxu0 %v2821_v26  ;;  %2396 = vmatpush3.bf16.msra.mxu1 %v2393_v43 }
  0x30   : > { %v587_v35 = vsub.f32 %v2963_v7, %v3395_v57  ;;  %v606_v37 = vand.u32 4294901760, %v2991_v48  ;;  %v660_v44 = vsub.f32 %v2836_v38, %v3396_v36  ;;  %v3012_v21 = vunpack.c.l.s8.bf16 %v264_v47  ;;  %2438 = vmatprep.subr.bf16.mxu0 %v2853_v50  ;;  %2219 = vmatmul.mubr.f32.gmra.mrb[6].mxu0 %v2904_v9 }
  0x31   : > { %2148 = vmatmul.mubr.f32.gmra.mrb[4].mxu1 %v548_v45  ;;  %v597_v58 = vsub.f32 %v2969_v32, %v3394_v46  ;;  %v667_v61 = vsub.f32 %v2838_v39, %v666_v25  ;;  %v3022_v49 = vunpack.c.h.s8.bf16 %v264_v47  ;;  %v2441_v12 = vpack.c.bf16 %v624_v1, %v617_v30  ;;  %2398 = vmatprep.subr.bf16.mxu1 %v2397_v23  ;;  %v265_v1 = vld [vmem:[%s2980_s13 + $0x8] sm:$0xff] }
  0x32   : > { %v578_v45 = vand.u32 4294901760, %v577_v27  ;;  %2150 = vmatprep.mubr.f32.mxu1 %v558_v0  ;;  %v2401_v60 = vpack.c.bf16 %v654_v31, %v647_v29  ;;  %v661_v46 = vand.u32 4294901760, %v660_v44  ;;  %v273_v36 = vunpack.c.l.bf16 %v3012_v21  ;;  %2221 = vmatprep.mubr.f32.mxu0 %v2914_v24 }
  0x33   : > { %v668_v57 = vand.u32 4294901760, %v667_v61  ;;  %v588_v47 = vand.u32 4294901760, %v587_v35  ;;  %v607_v15 = vsub.f32 %v2991_v48, %v606_v37  ;;  %v275_v16 = vunpack.c.l.bf16 %v3022_v49  ;;  %2440 = vmatpush3.bf16.msra.mxu0 %v2853_v50  ;;  %2400 = vmatpush3.bf16.msra.mxu1 %v2397_v23 }
  0x34   : > { %v598_v30 = vand.u32 4294901760, %v597_v58  ;;  %2442 = vmatprep.subr.bf16.mxu0 %v2441_v12  ;;  %2402 = vmatprep.subr.bf16.mxu1 %v2401_v60  ;;  %v274_v31 = vunpack.c.h.bf16 %v3012_v21  ;;  %v276_v0 = vunpack.c.h.bf16 %v3022_v49  ;;  %v3043_v27 = vunpack.c.l.s8.bf16 %v265_v1  ;;  %v266_v58 = vld [vmem:[%s2980_s13 + $0x10] sm:$0xff]  ;;  %s2621_s13 = sshll.u32 %s2682_s12, 4  ;;  %s2622_s13 = int_to_ptr.vmem [resolvable:$false] %s2621_s13 }
  0x35   : > { %2151 = vmatmul.mubr.f32.gmra.mrb[6].mxu1 %v568_v28  ;;  %v2405_v29 = vpack.c.bf16 %v668_v57, %v661_v46  ;;  %v286_v28 = vsel %vm285_vm1, %v273_v36, 0.0  ;;  %2222 = vmatmul.mubr.f32.gmra.mrb[8].mxu0 %v2963_v7  ;;  %v608_v43 = vand.u32 4294901760, %v607_v15  ;;  %v292_v44 = vsel %vm285_vm1, %v275_v16, 0.0  ;;  %s2623_s14 = scalar_lea.vmem %s2622_s13, 3072  ;;  %p2624_p0 = scmp.lt.s32.totalorder %s3331_s7, %s2622_s13 }
  0x36   : > { %2153 = vmatprep.mubr.f32.mxu1 %v578_v45  ;;  %2224 = vmatprep.mubr.f32.mxu0 %v2969_v32  ;;  %v289_v23 = vsel %vm285_vm1, %v274_v31, 0.0  ;;  %v295_v36 = vsel %vm285_vm1, %v276_v0, 0.0  ;;  %v278_v57 = vunpack.c.h.bf16 %v3043_v27  ;;  %v3050_v46 = vunpack.c.h.s8.bf16 %v265_v1  ;;  %p2625_p1 = scmp.lt.s32.totalorder %s2623_s14, %s2617_s11 }
  0x37   : > { %2404 = vmatpush3.bf16.msra.mxu1 %v2401_v60  ;;  %287 = vadd.xlane.f32.xlu0 %v286_v28  ;;  %v277_v35 = vunpack.c.l.bf16 %v3043_v27  ;;  %v2445_v61 = vpack.c.bf16 %v638_v33, %v631_v2  ;;  %v3399_v60 = vand.u32 4294901760, %v2887_v3  ;;  %v3400_v2 = vand.u32 4294901760, %v2803_v20 }
  0x38   : > { %2406 = vmatprep.subr.bf16.mxu1 %v2405_v29  ;;  %293 = vadd.xlane.f32.xlu1 %v292_v44  ;;  %v301_v45 = vsel %vm285_vm1, %v278_v57, 0.0  ;;  %v280_v51 = vunpack.c.h.bf16 %v3050_v46  ;;  %v279_v19 = vunpack.c.l.bf16 %v3050_v46  ;;  %v3401_v62 = vand.u32 4294901760, %v2808_v22  ;;  %p2626_p2 = por %p2625_p1, %p2624_p0 }
  0x39   : > { %2154 = vmatmul.mubr.f32.gmra.mrb[8].mxu1 %v588_v47  ;;  %2225 = vmatmul.mubr.f32.gmra.mrb[10].mxu0 %v2991_v48  ;;  %v298_v17 = vsel %vm285_vm1, %v277_v35, 0.0  ;;  %v3402_v33 = vand.u32 4294901760, %v2890_v4  ;;  %v3081_v47 = vunpack.c.h.s8.bf16 %v266_v58  ;;  %v3403_v20 = vand.u32 4294901760, %v2893_v5 }
  0x3a   : > { %2156 = vmatprep.mubr.f32.mxu1 %v598_v30  ;;  %2243 = vmatprep.mubr.f32.mxu0 %v496_v11  ;;  %v3065_v11 = vunpack.c.l.s8.bf16 %v266_v58  ;;  %v307_v3 = vsel %vm285_vm1, %v280_v51, 0.0  ;;  %v304_v22 = vsel %vm285_vm1, %v279_v19, 0.0  ;;  %v3404_v16 = vand.u32 4294901760, %v2836_v38  ;;  %p2627_p3 = pnand %p2626_p2, %p2620_p13 }
  0x3b   : > { %2408 = vmatpush3.bf16.msra.mxu1 %v2405_v29  ;;  %290 = vadd.xlane.f32.xlu0 %v289_v23  ;;  %v3405_v30 = vand.u32 4294901760, %v2896_v6  ;;  %v284_v1 = vunpack.c.h.bf16 %v3081_v47  ;;  %v3406_v29 = vand.u32 4294901760, %v2901_v8  ;;  %v283_v39 = vunpack.c.l.bf16 %v3081_v47 }
  0x3c   : > { %296 = vadd.xlane.f32.xlu1 %v295_v36  ;;  %v281_v15 = vunpack.c.l.bf16 %v3065_v11  ;;  %v2453_v4 = vpack.c.bf16 %v666_v25, %v3404_v16  ;;  %v3407_v6 = vand.u32 4294901760, %v2904_v9  ;;  %v3408_v8 = vand.u32 4294901760, %v2914_v24 }
  0x3d   : > { %2157 = vmatmul.mubr.f32.gmra.mrb[10].mxu1 %v608_v43  ;;  %2244 = vmatmul.mubr.f32.vlgmr.msra.gmra.mrb[0].mxu0 %v506_v13  ;;  %v2449_v13 = vpack.c.bf16 %v3401_v62, %v3400_v2  ;;  %v319_v25 = vsel %vm285_vm1, %v284_v1, 0.0  ;;  %v316_v28 = vsel %vm285_vm1, %v283_v39, 0.0  ;;  %v3409_v31 = vand.u32 4294901760, %v2963_v7  ;;  %v3139_v7 = vld [vmem:[%s3133_s16] sm:$0xff] }
  0x3e   : > { %2175 = vmatprep.mubr.f32.mxu1 %v2840_v40  ;;  %2444 = vmatpush3.bf16.msra.mxu0 %v2441_v12  ;;  %v282_v12 = vunpack.c.h.bf16 %v3065_v11  ;;  %v310_v38 = vsel %vm285_vm1, %v281_v15, 0.0  ;;  %v3410_v9 = vand.u32 4294901760, %v2969_v32  ;;  %v2681_v24 = vmov 0  }
  0x3f   : > { %2246 = vmatprep.mubr.f32.mxu0 %v3399_v60  ;;  %2446 = vmatprep.subr.bf16.mxu0 %v2445_v61 }
  0x40   : > { %302 = vadd.xlane.f32.xlu1 %v301_v45  ;;  %299 = vadd.xlane.f32.xlu0 %v298_v17  ;;  %v313_v5 = vsel %vm285_vm1, %v282_v12, 0.0 }
  0x41   : > { %2176 = vmatmul.mubr.f32.vlgmr.msra.gmra.mrb[0].mxu1 %v2842_v41  ;;  %2247 = vmatmul.mubr.f32.gmra.mrb[2].mxu0 %v3402_v33 }
  0x42   : > { %2178 = vmatprep.mubr.f32.mxu1 %v2858_v52  ;;  %2249 = vmatprep.mubr.f32.mxu0 %v3403_v20 }
  0x43   : > { %2448 = vmatpush3.bf16.msra.mxu0 %v2445_v61  ;;  %2591 = vset.pattern.permute.xlu1 %v2681_v24 }
  0x44   : > { %2450 = vmatprep.subr.bf16.mxu0 %v2449_v13  ;;  %308 = vadd.xlane.f32.xlu1 %v307_v3 }
  0x45   : > { %2179 = vmatmul.mubr.f32.gmra.mrb[2].mxu1 %v2860_v53  ;;  %2250 = vmatmul.mubr.f32.gmra.mrb[4].mxu0 %v3405_v30 }
  0x46   : > { %2181 = vmatprep.mubr.f32.mxu1 %v2863_v54  ;;  %305 = vadd.xlane.f32.xlu0 %v304_v22 }
  0x47   : > { %2252 = vmatprep.mubr.f32.mxu0 %v3406_v29  ;;  %2452 = vmatpush3.bf16.msra.mxu0 %v2449_v13 }
  0x48   : > { %2454 = vmatprep.subr.bf16.mxu0 %v2453_v4  ;;  %314 = vadd.xlane.f32.xlu1 %v313_v5 }
  0x49   : > { %2182 = vmatmul.mubr.f32.gmra.mrb[4].mxu1 %v2865_v55  ;;  %2253 = vmatmul.mubr.f32.gmra.mrb[6].mxu0 %v3407_v6 }
  0x4a   : > { %2184 = vmatprep.mubr.f32.mxu1 %v2867_v56  ;;  %311 = vadd.xlane.f32.xlu0 %v310_v38 }
  0x4b   : > { %2255 = vmatprep.mubr.f32.mxu0 %v3408_v8  ;;  %2456 = vmatpush3.bf16.msra.mxu0 %v2453_v4 }
  0x4c   : > { %2458 = vmatprep.subr.bf16.mxu0 %v2791_v14  ;;  %320 = vadd.xlane.f32.xlu1 %v319_v25 }
  0x4d   : > { %2185 = vmatmul.mubr.f32.gmra.mrb[6].mxu1 %v2873_v59  ;;  %2256 = vmatmul.mubr.f32.gmra.mrb[8].mxu0 %v3409_v31 }
  0x4e   : > { %2187 = vmatprep.mubr.f32.mxu1 %v2880_v63  ;;  %317 = vadd.xlane.f32.xlu0 %v316_v28 }
  0x4f   : > { %2258 = vmatprep.mubr.f32.mxu0 %v3410_v9  ;;  %2592 = vset.pattern.permute.xlu0 %v2681_v24 }
  0x51   : > { %2188 = vmatmul.mubr.f32.gmra.mrb[8].mxu1 %v2906_v10  ;;  %2259 = vmatmul.mubr.f32.gmra.mrb[10].mxu0 %v606_v37 }
  0x52   : > { %2190 = vmatprep.mubr.f32.mxu1 %v2932_v34  ;;  %2277 = vmatprep.mubr.f32.mxu0 %v2840_v40 }
  0x55   : > { %2191 = vmatmul.mubr.f32.gmra.mrb[10].mxu1 %v2939_v42  ;;  %2278 = vmatmul.mubr.f32.vlgmr.msra.gmra.mrb[0].mxu0 %v2842_v41 }
  0x56   : > { %2341 = vmatprep.mubr.msk.bf16.mxu1 %vm285_vm1, %v3012_v21  ;;  %2460 = vmatpush3.bf16.msra.mxu0 %v2791_v14  ;;  %v3166_v14 = vld [vmem:[%s3133_s16 + $0x10] sm:$0xff] }
  0x57   : > { %2280 = vmatprep.mubr.f32.mxu0 %v2858_v52  ;;  %2462 = vmatprep.subr.bf16.mxu0 %v2799_v18 }
  0x59   : > { %2281 = vmatmul.mubr.f32.gmra.mrb[2].mxu0 %v2860_v53 }
  0x5a   : > { %2283 = vmatprep.mubr.f32.mxu0 %v2863_v54  ;;  %2464 = vmatpush3.bf16.msra.mxu0 %v2799_v18  ;;  %v3170_v18 = vld [vmem:[%s3133_s16 + $0x20] sm:$0xff] }
  0x5b   : > { %2466 = vmatprep.subr.bf16.mxu0 %v2821_v26 }
  0x5d   : > { %2284 = vmatmul.mubr.f32.gmra.mrb[4].mxu0 %v2865_v55  ;;  %1758 = vperm.xlu1 %2591, %v3139_v7  }
  0x5e   : > { %2286 = vmatprep.mubr.f32.mxu0 %v2867_v56  ;;  %2468 = vmatpush3.bf16.msra.mxu0 %v2821_v26  ;;  %v1660_v26 = vld [vmem:[%s3133_s16 + $0x8] sm:$0xff] }
  0x5f   : > { %2470 = vmatprep.subr.bf16.mxu0 %v2853_v50 }
  0x61   : > { %2287 = vmatmul.mubr.f32.gmra.mrb[6].mxu0 %v2873_v59  ;;  %1768 = vperm.xlu1 %2591, %v3166_v14  }
  0x62   : > { %2289 = vmatprep.mubr.f32.mxu0 %v2880_v63  ;;  %2472 = vmatpush3.bf16.msra.mxu0 %v2853_v50  ;;  %v3183_v50 = vld [vmem:[%s3133_s16 + $0x40] sm:$0xff] }
  0x64   : > { %1763 = vperm.xlu0 %2592, %v1660_v26  }
  0x65   : > { %2290 = vmatmul.mubr.f32.gmra.mrb[8].mxu0 %v2906_v10  ;;  %1778 = vperm.xlu1 %2591, %v3170_v18  }
  0x66   : > { %2292 = vmatprep.mubr.f32.mxu0 %v2932_v34 }
  0x69   : > { %2293 = vmatmul.mubr.f32.gmra.mrb[10].mxu0 %v2939_v42 }
  0x6a   : > { %2311 = vmatprep.mubr.f32.mxu0 %v2840_v40  ;;  %v3175_v40 = vld [vmem:[%s3133_s16 + $0x30] sm:$0xff] }
  0x6b   : > { %1788 = vperm.xlu1 %2591, %v3175_v40  }
  0x6d   : > { %2312 = vmatmul.mubr.f32.vlgmr.msra.gmra.mrb[0].mxu0 %v2842_v41  ;;  %v3178_v41 = vld [vmem:[%s3133_s16 + $0x18] sm:$0xff] }
  0x6e   : > { %2314 = vmatprep.mubr.f32.mxu0 %v2858_v52  ;;  %1773 = vperm.xlu0 %2592, %v3178_v41   ;;  %v3186_v52 = vld [vmem:[%s3133_s16 + $0x28] sm:$0xff] }
  0x6f   : > { %1798 = vperm.xlu1 %2591, %v3183_v50  }
  0x71   : > { %2315 = vmatmul.mubr.f32.gmra.mrb[2].mxu0 %v2860_v53  ;;  %v3191_v53 = vld [vmem:[%s3133_s16 + $0x38] sm:$0xff] }
  0x72   : > { %2317 = vmatprep.mubr.f32.mxu0 %v2863_v54  ;;  %1783 = vperm.xlu0 %2592, %v3186_v52   ;;  %v3195_v54 = vld [vmem:[%s3133_s16 + $0x48] sm:$0xff] }
  0x75   : > { %2318 = vmatmul.mubr.f32.gmra.mrb[4].mxu0 %v2865_v55 }
  0x76   : > { %2320 = vmatprep.mubr.f32.mxu0 %v2867_v56  ;;  %1793 = vperm.xlu0 %2592, %v3191_v53  }
  0x79   : > { %2321 = vmatmul.mubr.f32.gmra.mrb[6].mxu0 %v2873_v59 }
  0x7a   : > { %2323 = vmatprep.mubr.f32.mxu0 %v2880_v63  ;;  %1803 = vperm.xlu0 %2592, %v3195_v54  }
  0x7d   : > { %2324 = vmatmul.mubr.f32.gmra.mrb[8].mxu0 %v2906_v10 }
  0x7e   : > { %2326 = vmatprep.mubr.f32.mxu0 %v2932_v34 }
  0x81   : > { %2327 = vmatmul.mubr.f32.gmra.mrb[10].mxu0 %v2939_v42 }
  0xc4   : > { %v288_v55 = vpop.xlane.xlu0 %287 }
  0xc5   : > { %v294_v56 = vpop.xlane.xlu1 %293 }
  0xc8   : > { %v291_v59 = vpop.xlane.xlu0 %290 }
  0xc9   : > { %v322_v63 = vpack.c.bf16 %v291_v59, %v288_v55  ;;  %v297_v10 = vpop.xlane.xlu1 %296 }
  0xca   : > { %v323_v34 = vpack.c.bf16 %v297_v10, %v294_v56 }
  0xcb   : > { %v328_v42 = vunpack.c.l.bf16 %v322_v63  ;;  %v329_v32 = vunpack.c.h.bf16 %v322_v63 }
  0xcc   : > { %v330_v48 = vunpack.c.l.bf16 %v323_v34  ;;  %v331_v37 = vunpack.c.h.bf16 %v323_v34  ;;  %v1670_v34 = vld [vmem:[%s3133_s16 + $0x58] sm:$0xff] }
  0xcd   : > { %v340_v43 = vmax.f32 %v328_v42, 1.0  ;;  %v341_v44 = vmax.f32 %v329_v32, 1.0  ;;  %v303_v0 = vpop.xlane.xlu1 %302  ;;  %v300_v36 = vpop.xlane.xlu0 %299 }
  0xce   : > { %v342_v23 = vmax.f32 %v330_v48, 1.0  ;;  %v324_v57 = vpack.c.bf16 %v303_v0, %v300_v36  ;;  %v343_v35 = vmax.f32 %v331_v37, 1.0 }
  0xcf   : > { %2593 = vrsqrt.f32 %v340_v43 }
  0xd0   : > { %2595 = vrsqrt.f32 %v341_v44  ;;  %v332_v58 = vunpack.c.l.bf16 %v324_v57  ;;  %v333_v51 = vunpack.c.h.bf16 %v324_v57  ;;  %v1669_v44 = vld [vmem:[%s3133_s16 + $0x50] sm:$0xff] }
  0xd1   : > { %2597 = vrsqrt.f32 %v342_v23  ;;  %v309_v61 = vpop.xlane.xlu1 %308 }
  0xd2   : > { %2599 = vrsqrt.f32 %v343_v35  ;;  %v344_v60 = vmax.f32 %v332_v58, 1.0  ;;  %v345_v13 = vmax.f32 %v333_v51, 1.0 }
  0xd3   : > { %v306_v45 = vpop.xlane.xlu0 %305 }
  0xd4   : > { %v325_v17 = vpack.c.bf16 %v309_v61, %v306_v45  ;;  %2601 = vrsqrt.f32 %v344_v60 }
  0xd5   : > { %v315_v19 = vpop.xlane.xlu1 %314  ;;  %2603 = vrsqrt.f32 %v345_v13 }
  0xd6   : > { %v334_v33 = vunpack.c.l.bf16 %v325_v17  ;;  %v335_v29 = vunpack.c.h.bf16 %v325_v17 }
  0xd7   : > { %v312_v2 = vpop.xlane.xlu0 %311 }
  0xd8   : > { %v326_v62 = vpack.c.bf16 %v315_v19, %v312_v2  ;;  %v346_v38 = vmax.f32 %v334_v33, 1.0  ;;  %v347_v28 = vmax.f32 %v335_v29, 1.0 }
  0xd9   : > { %v3198_v3 = vpop.eup %2593  ;;  %v321_v20 = vpop.xlane.xlu1 %320 }
  0xda   : > { %v337_v12 = vunpack.c.h.bf16 %v326_v62  ;;  %v3200_v22 = vpop.eup %2595  ;;  %v1671_v15 = vmul.f32 %v3198_v3, %v3139_v7  ;;  %v336_v31 = vunpack.c.l.bf16 %v326_v62 }
  0xdb   : > { %v318_v16 = vpop.xlane.xlu0 %317  ;;  %v3204_v4 = vpop.eup %2597  ;;  %v1672_v30 = vmul.f32 %v3200_v22, %v1660_v26 }
  0xdc   : > { %v349_v5 = vmax.f32 %v337_v12, 1.0  ;;  %v327_v1 = vpack.c.bf16 %v321_v20, %v318_v16  ;;  %1685 = vperm.xlu0 %2592, %v1671_v15   ;;  %v1673_v39 = vmul.f32 %v3204_v4, %v3166_v14  ;;  %v3209_v25 = vpop.eup %2599  ;;  %v348_v7 = vmax.f32 %v336_v31, 1.0 }
  0xdd   : > { %1690 = vperm.xlu1 %2591, %v1672_v30   ;;  %v1674_v9 = vmul.f32 %v3209_v25, %v3178_v41 }
  0xde   : > { %v339_v6 = vunpack.c.h.bf16 %v327_v1  ;;  %2605 = vrsqrt.f32 %v349_v5  ;;  %v3213_v24 = vpop.eup %2601  ;;  %v338_v26 = vunpack.c.l.bf16 %v327_v1 }
  0xdf   : > { %2607 = vrsqrt.f32 %v346_v38  ;;  %v1675_v14 = vmul.f32 %v3213_v24, %v3170_v18  ;;  %v3217_v55 = vpop.eup %2603 }
  0xe0   : > { %v351_v8 = vmax.f32 %v339_v6, 1.0  ;;  %v350_v59 = vmax.f32 %v338_v26, 1.0  ;;  %v1676_v41 = vmul.f32 %v3217_v55, %v3186_v52 }
  0xe1   : > { %1695 = vperm.xlu1 %2591, %v1673_v39  }
  0xe2   : > { %2609 = vrsqrt.f32 %v351_v8 }
  0xe3   : > { %2611 = vrsqrt.f32 %v347_v28 }
  0xe4   : > { %2613 = vrsqrt.f32 %v348_v7 }
  0xe5   : > { %1700 = vperm.xlu1 %2591, %v1674_v9   ;;  %2615 = vrsqrt.f32 %v350_v59 }
  0xe8   : > { %v3219_v56 = vpop.eup %2605 }
  0xe9   : > { %1705 = vperm.xlu1 %2591, %v1675_v14   ;;  %v1680_v63 = vmul.f32 %v3219_v56, %v3195_v54  ;;  %v3225_v10 = vpop.eup %2607 }
  0xea   : > { %v1677_v18 = vmul.f32 %v3225_v10, %v3175_v40 }
  0xeb   : > { %1730 = vperm.xlu0 %2592, %v1680_v63  }
  0xec   : > { %v3228_v42 = vpop.eup %2609 }
  0xed   : > { %1710 = vperm.xlu1 %2591, %v1676_v41   ;;  %v1682_v32 = vmul.f32 %v3228_v42, %v1670_v34  ;;  %v2612_v48 = vpop.eup %2611 }
  0xee   : > { %v1678_v52 = vmul.f32 %v2612_v48, %v3191_v53  ;;  %v3234_v54 = vpop.eup %2613 }
  0xef   : > { %1740 = vperm.xlu0 %2592, %v1682_v32   ;;  %v1679_v37 = vmul.f32 %v3234_v54, %v3183_v50  ;;  %v3238_v43 = vpop.eup %2615 }
  0xf0   : > { %v1681_v40 = vmul.f32 %v3238_v43, %v1669_v44 }
  0xf1   : > { %1715 = vperm.xlu1 %2591, %v1677_v18  }
  0xf3   : > { %1813 = vperm.xlu0 %2592, %v1670_v34  }
  0xf5   : > { %1720 = vperm.xlu1 %2591, %v1678_v52  }
  0xf9   : > { %1725 = vperm.xlu1 %2591, %v1679_v37  }
  0xfd   : > { %1735 = vperm.xlu1 %2591, %v1681_v40  }
 0x101   : > { %1808 = vperm.xlu1 %2591, %v1669_v44  }
 0x114   : > { %v2177_v0 = vpop.f32.mrb[0].mxu1 }
 0x115   : > { %v721_v23 = vpop.f32.mrb[1].mxu1 }
 0x118   : > { %v2180_v36 = vpop.f32.mrb[2].mxu1 }
 0x119   : > { %v733_v57 = vpop.f32.mrb[3].mxu1 }
 0x11c   : > { %v2183_v53 = vpop.f32.mrb[4].mxu1 }
 0x11d   : > { %v745_v35 = vpop.f32.mrb[5].mxu1 }
 0x120   : > { %v2186_v58 = vpop.f32.mrb[6].mxu1 }
 0x121   : > { %v757_v61 = vpop.f32.mrb[7].mxu1 }
 0x124   : > { %v2189_v45 = vpop.f32.mrb[8].mxu1 }
 0x125   : > { %v769_v51 = vpop.f32.mrb[9].mxu1 }
 0x128   : > { %v2192_v60 = vpop.f32.mrb[10].mxu1 }
 0x129   : > { %v781_v50 = vpop.f32.mrb[11].mxu1 }
 0x140   : > { %v2313_v17 = vpop.f32.mrb[0].mxu0 }
 0x141   : > { %v2473_v19 = vadd.f32 %v2313_v17, %v2177_v0  ;;  %v1361_v2 = vpop.f32.mrb[1].mxu0 }
 0x142   : > { %v2474_v62 = vadd.f32 %v1361_v2, %v721_v23 }
 0x143   : > { %v1432_v13 = vmul.f32 %v3200_v22, %v2473_v19 }
 0x144   : > { %v1431_v33 = vmul.f32 %v3198_v3, %v2474_v62  ;;  %v2316_v12 = vpop.f32.mrb[2].mxu0 }
 0x145   : > { %v2475_v20 = vadd.f32 %v2316_v12, %v2180_v36  ;;  %v1373_v15 = vpop.f32.mrb[3].mxu0 }
 0x146   : > { %v3244_v16 = vpack.c.bf16 %v1432_v13, %v1431_v33  ;;  %v2476_v30 = vadd.f32 %v1373_v15, %v733_v57 }
 0x147   : > { %v1434_v5 = vmul.f32 %v3209_v25, %v2475_v20 }
 0x148   : > { %v1449_v1 = vunpack.c.l.bf16 %v3244_v16  ;;  %v1433_v29 = vmul.f32 %v3204_v4, %v2476_v30  ;;  %v2319_v38 = vpop.f32.mrb[4].mxu0  ;;  %v1450_v39 = vunpack.c.h.bf16 %v3244_v16 }
 0x149   : > { %v2477_v6 = vadd.f32 %v2319_v38, %v2183_v53  ;;  %v1385_v8 = vpop.f32.mrb[5].mxu0 }
 0x14a   : > { %v1461_v22 = vsub.f32 %v1431_v33, %v1449_v1  ;;  %v3250_v28 = vpack.c.bf16 %v1434_v5, %v1433_v29  ;;  %v2478_v3 = vadd.f32 %v1385_v8, %v745_v35  ;;  %v1462_v31 = vsub.f32 %v1432_v13, %v1450_v39 }
 0x14b   : > { %v1436_v9 = vmul.f32 %v3217_v55, %v2477_v6 }
 0x14c   : > { %v1451_v7 = vunpack.c.l.bf16 %v3250_v28  ;;  %v1435_v25 = vmul.f32 %v3213_v24, %v2478_v3  ;;  %v2322_v26 = vpop.f32.mrb[6].mxu0  ;;  %v1473_v14 = vpack.c.bf16 %v1462_v31, %v1461_v22  ;;  %v1452_v4 = vunpack.c.h.bf16 %v3250_v28 }
 0x14d   : > { %v2479_v59 = vadd.f32 %v2322_v26, %v2186_v58  ;;  %v1397_v41 = vpop.f32.mrb[7].mxu0 }
 0x14e   : > { %v1463_v63 = vsub.f32 %v1433_v29, %v1451_v7  ;;  %v1445_v34 = vpack.c.bf16 %v1436_v9, %v1435_v25  ;;  %v2480_v18 = vadd.f32 %v1397_v41, %v757_v61  ;;  %2329 = vmatprep.subr.bf16.mxu1 %v1473_v14  ;;  %v1464_v32 = vsub.f32 %v1434_v5, %v1452_v4 }
 0x14f   : > { %v1438_v52 = vmul.f32 %v2612_v48, %v2479_v59  ;;  %2330 = vmatpush3.bf16.msra.mxu1 %v1473_v14 }
 0x150   : > { %v1453_v37 = vunpack.c.l.bf16 %v1445_v34  ;;  %v1437_v55 = vmul.f32 %v3225_v10, %v2480_v18  ;;  %v2325_v44 = vpop.f32.mrb[8].mxu0  ;;  %v1474_v40 = vpack.c.bf16 %v1464_v32, %v1463_v63  ;;  %v1454_v0 = vunpack.c.h.bf16 %v1445_v34 }
 0x151   : > { %v2481_v24 = vadd.f32 %v2325_v44, %v2189_v45  ;;  %v1409_v23 = vpop.f32.mrb[9].mxu0 }
 0x152   : > { %v1465_v36 = vsub.f32 %v1435_v25, %v1453_v37  ;;  %v1446_v57 = vpack.c.bf16 %v1438_v52, %v1437_v55  ;;  %v2482_v53 = vadd.f32 %v1409_v23, %v769_v51  ;;  %2331 = vmatprep.subr.bf16.mxu1 %v1474_v40  ;;  %v1466_v35 = vsub.f32 %v1436_v9, %v1454_v0 }
 0x153   : > { %v1440_v58 = vmul.f32 %v3219_v56, %v2481_v24  ;;  %2332 = vmatpush3.bf16.msra.mxu1 %v1474_v40 }
 0x154   : > { %v1455_v61 = vunpack.c.l.bf16 %v1446_v57  ;;  %v1439_v48 = vmul.f32 %v3234_v54, %v2482_v53  ;;  %v2328_v17 = vpop.f32.mrb[10].mxu0  ;;  %v1475_v19 = vpack.c.bf16 %v1466_v35, %v1465_v36  ;;  %v1456_v2 = vunpack.c.h.bf16 %v1446_v57 }
 0x155   : > { %v2483_v10 = vadd.f32 %v2328_v17, %v2192_v60  ;;  %v1421_v62 = vpop.f32.mrb[11].mxu0 }
 0x156   : > { %v1467_v13 = vsub.f32 %v1437_v55, %v1455_v61  ;;  %v1447_v33 = vpack.c.bf16 %v1440_v58, %v1439_v48  ;;  %v2484_v45 = vadd.f32 %v1421_v62, %v781_v50  ;;  %2333 = vmatprep.subr.bf16.mxu1 %v1475_v19  ;;  %v1468_v12 = vsub.f32 %v1438_v52, %v1456_v2 }
 0x157   : > { %v1442_v51 = vmul.f32 %v3228_v42, %v2483_v10  ;;  %2334 = vmatpush3.bf16.msra.mxu1 %v1475_v19  ;;  %v1759_v42 = vpop.permute.xlu1 %1758 }
 0x158   : > { %v1457_v20 = vunpack.c.l.bf16 %v1447_v33  ;;  %v1441_v56 = vmul.f32 %v3238_v43, %v2484_v45  ;;  %v1476_v15 = vpack.c.bf16 %v1468_v12, %v1467_v13  ;;  %v1458_v30 = vunpack.c.h.bf16 %v1447_v33 }
 0x15a   : > { %v1469_v5 = vsub.f32 %v1439_v48, %v1457_v20  ;;  %v1448_v54 = vpack.c.bf16 %v1442_v51, %v1441_v56  ;;  %2335 = vmatprep.subr.bf16.mxu1 %v1476_v15  ;;  %v1470_v1 = vsub.f32 %v1440_v58, %v1458_v30 }
 0x15b   : > { %2336 = vmatpush3.bf16.msra.mxu1 %v1476_v15 }
 0x15c   : > { %v1459_v60 = vunpack.c.l.bf16 %v1448_v54  ;;  %v1477_v29 = vpack.c.bf16 %v1470_v1, %v1469_v5  ;;  %v1460_v38 = vunpack.c.h.bf16 %v1448_v54 }
 0x15e   : > { %v1471_v39 = vsub.f32 %v1441_v56, %v1459_v60  ;;  %2337 = vmatprep.subr.bf16.mxu1 %v1477_v29  ;;  %v1472_v50 = vsub.f32 %v1442_v51, %v1460_v38 }
 0x15f   : > { %2338 = vmatpush3.bf16.msra.mxu1 %v1477_v29 }
 0x160   : > { %v1478_v6 = vpack.c.bf16 %v1472_v50, %v1471_v39 }
 0x162   : > { %2339 = vmatprep.subr.bf16.mxu1 %v1478_v6 }
 0x163   : > { %2340 = vmatpush3.bf16.msra.mxu1 %v1478_v6 }
 0x164   : > { %2353 = vmatprep.subr.bf16.mxu1 %v3244_v16 }
 0x166   : > { %2342 = vmatmul.mubr.msk.bf16.vlgmr.msra.gmra.mrb[12].mxu1 %vm285_vm1, %v3022_v49 }
 0x167   : > { %2354 = vmatpush3.bf16.msra.mxu1 %v3244_v16  ;;  %2345 = vmatprep.mubr.msk.bf16.mxu1 %vm285_vm1, %v3043_v27 }
 0x168   : > { %2355 = vmatprep.subr.bf16.mxu1 %v3250_v28 }
 0x16b   : > { %2356 = vmatpush3.bf16.msra.mxu1 %v3250_v28 }
 0x16c   : > { %2357 = vmatprep.subr.bf16.mxu1 %v1445_v34 }
 0x16e   : > { %2346 = vmatmul.mubr.msk.bf16.gmra.mrb[16].mxu1 %vm285_vm1, %v3050_v46 }
 0x16f   : > { %2358 = vmatpush3.bf16.msra.mxu1 %v1445_v34  ;;  %2349 = vmatprep.mubr.msk.bf16.mxu1 %vm285_vm1, %v3065_v11 }
 0x170   : > { %2359 = vmatprep.subr.bf16.mxu1 %v1446_v57 }
 0x173   : > { %2360 = vmatpush3.bf16.msra.mxu1 %v1446_v57 }
 0x174   : > { %2361 = vmatprep.subr.bf16.mxu1 %v1447_v33 }
 0x176   : > { %2350 = vmatmul.mubr.msk.bf16.gmra.mrb[20].mxu1 %vm285_vm1, %v3081_v47 }
 0x177   : > { %2362 = vmatpush3.bf16.msra.mxu1 %v1447_v33  ;;  %2365 = vmatprep.mubr.msk.bf16.mxu1 %vm285_vm1, %v3012_v21  ;;  %v1769_v21 = vpop.permute.xlu1 %1768 }
 0x178   : > { %2363 = vmatprep.subr.bf16.mxu1 %v1448_v54 }
 0x17b   : > { %2364 = vmatpush3.bf16.msra.mxu1 %v1448_v54  ;;  %v1779_v43 = vpop.permute.xlu1 %1778 }
 0x17e   : > { %2366 = vmatmul.mubr.msk.bf16.vlgmr.msra.gmra.mrb[12].mxu1 %vm285_vm1, %v3022_v49 }
 0x17f   : > { %2369 = vmatprep.mubr.msk.bf16.mxu1 %vm285_vm1, %v3043_v27  ;;  %v1789_v16 = vpop.permute.xlu1 %1788  ;;  %v1764_v27 = vpop.permute.xlu0 %1763 }
 0x183   : > { %v3287_v8 = vpop.permute.xlu1 %1798  ;;  %v1774_v3 = vpop.permute.xlu0 %1773 }
 0x186   : > { %2370 = vmatmul.mubr.msk.bf16.gmra.mrb[16].mxu1 %vm285_vm1, %v3050_v46 }
 0x187   : > { %2373 = vmatprep.mubr.msk.bf16.mxu1 %vm285_vm1, %v3065_v11  ;;  %v1691_v49 = vpop.permute.xlu1 %1690  ;;  %v1784_v31 = vpop.permute.xlu0 %1783 }
 0x18b   : > { %v1696_v22 = vpop.permute.xlu1 %1695  ;;  %v1794_v11 = vpop.permute.xlu0 %1793 }
 0x18e   : > { %2374 = vmatmul.mubr.msk.bf16.gmra.mrb[20].mxu1 %vm285_vm1, %v3081_v47  ;;  %v3295_v47 = vld [vmem:[%s3383_s4] ss:$0 sm:$0xff] }
 0x18f   : > { %v1701_v28 = vpop.permute.xlu1 %1700  ;;  %v3289_v25 = vpop.permute.xlu0 %1803  ;;  %v1824_v4 = vmul.f32 %v3295_v47, %v1769_v21  ;;  %v1822_v34 = vmul.f32 %v3295_v47, %v1759_v42  ;;  %v1825_v52 = vmul.f32 %v3295_v47, %v1774_v3  ;;  %v1823_v40 = vmul.f32 %v3295_v47, %v1764_v27 }
 0x190   : > { %v1828_v58 = vmul.f32 %v3295_v47, %v1789_v16  ;;  %v1826_v17 = vmul.f32 %v3295_v47, %v1779_v43  ;;  %v1829_v62 = vmul.f32 %v3295_v47, %v1794_v11  ;;  %v1827_v12 = vmul.f32 %v3295_v47, %v1784_v31 }
 0x191   : > { %v1830_v39 = vmul.f32 %v3295_v47, %v3287_v8 }
 0x193   : > { %v1706_v46 = vpop.permute.xlu1 %1705  ;;  %v1686_v59 = vpop.permute.xlu0 %1685 }
 0x197   : > { %v1711_v9 = vpop.permute.xlu1 %1710  ;;  %v1731_v57 = vpop.permute.xlu0 %1730 }
 0x19b   : > { %v1716_v7 = vpop.permute.xlu1 %1715  ;;  %v1741_v51 = vpop.permute.xlu0 %1740 }
 0x19f   : > { %v1721_v26 = vpop.permute.xlu1 %1720  ;;  %v1814_v54 = vpop.permute.xlu0 %1813 }
 0x1a0   : > { %v1833_v42 = vmul.f32 %v3295_v47, %v1814_v54 }
 0x1a3   : > { %v1726_v0 = vpop.permute.xlu1 %1725 }
 0x1a7   : > { %v1736_v19 = vpop.permute.xlu1 %1735 }
 0x1ab   : > { %v1809_v30 = vpop.permute.xlu1 %1808 }
 0x1ac   : > { %v1832_v60 = vmul.f32 %v3295_v47, %v1809_v30 }
 0x251   : > { %v2367_v14 = vpop.f32.mrb[12].mxu1 }
 0x252   : > { %v1745_v41 = vmul.f32 %v2367_v14, %v1696_v22  ;;  %v1612_v63 = vpop.f32.mrb[13].mxu1 }
 0x253   : > { %v1743_v18 = vmul.f32 %v1686_v59, %v1612_v63  ;;  %v2368_v32 = vpop.f32.mrb[14].mxu1 }
 0x254   : > { %v1836_v37 = vadd.f32 %v1824_v4, %v1745_v41  ;;  %v1746_v55 = vmul.f32 %v2368_v32, %v1701_v28  ;;  %v1615_v44 = vpop.f32.mrb[15].mxu1 }
 0x255   : > { %v1834_v24 = vadd.f32 %v1822_v34, %v1743_v18  ;;  %v1744_v23 = vmul.f32 %v1691_v49, %v1615_v44  ;;  %v1831_v49 = vmul.f32 %v3295_v47, %v3289_v25 }
 0x256   : > { %1848 = vst [vmem:[%s3303_s30 + $0x10] sm:$0xff] %v1836_v37  ;;  %v1837_v36 = vadd.f32 %v1825_v52, %v1746_v55 }
 0x257   : > { %1846 = vst [vmem:[%s3303_s30] sm:$0xff] %v1834_v24  ;;  %v1835_v53 = vadd.f32 %v1823_v40, %v1744_v23 }
 0x258   : > { %1849 = vst [vmem:[%s3303_s30 + $0x18] sm:$0xff] %v1837_v36 }
 0x259   : > { %1847 = vst [vmem:[%s3303_s30 + $0x8] sm:$0xff] %v1835_v53  ;;  %v2371_v35 = vpop.f32.mrb[16].mxu1 }
 0x25a   : > { %v1749_v61 = vmul.f32 %v2371_v35, %v1716_v7  ;;  %v1628_v48 = vpop.f32.mrb[17].mxu1 }
 0x25b   : > { %v1747_v2 = vmul.f32 %v1706_v46, %v1628_v48  ;;  %v2372_v10 = vpop.f32.mrb[18].mxu1 }
 0x25c   : > { %v1840_v13 = vadd.f32 %v1828_v58, %v1749_v61  ;;  %v1750_v33 = vmul.f32 %v2372_v10, %v1721_v26  ;;  %v1631_v45 = vpop.f32.mrb[19].mxu1 }
 0x25d   : > { %v1838_v20 = vadd.f32 %v1826_v17, %v1747_v2  ;;  %v1748_v56 = vmul.f32 %v1711_v9, %v1631_v45 }
 0x25e   : > { %1852 = vst [vmem:[%s3303_s30 + $0x30] sm:$0xff] %v1840_v13  ;;  %v1841_v15 = vadd.f32 %v1829_v62, %v1750_v33 }
 0x25f   : > { %1850 = vst [vmem:[%s3303_s30 + $0x20] sm:$0xff] %v1838_v20  ;;  %v1839_v5 = vadd.f32 %v1827_v12, %v1748_v56 }
 0x260   : > { %1853 = vst [vmem:[%s3303_s30 + $0x38] sm:$0xff] %v1841_v15 }
 0x261   : > { %1851 = vst [vmem:[%s3303_s30 + $0x28] sm:$0xff] %v1839_v5  ;;  %v2375_v1 = vpop.f32.mrb[20].mxu1 }
 0x262   : > { %v1753_v29 = vmul.f32 %v2375_v1, %v1736_v19  ;;  %v1644_v38 = vpop.f32.mrb[21].mxu1 }
 0x263   : > { %v1751_v50 = vmul.f32 %v1726_v0, %v1644_v38  ;;  %v2376_v6 = vpop.f32.mrb[22].mxu1 }
 0x264   : > { %v1844_v21 = vadd.f32 %v1832_v60, %v1753_v29  ;;  %v1754_v43 = vmul.f32 %v2376_v6, %v1741_v51  ;;  %v1647_v16 = vpop.f32.mrb[23].mxu1 }
 0x265   : > { %v1842_v22 = vadd.f32 %v1830_v39, %v1751_v50  ;;  %v1752_v27 = vmul.f32 %v1731_v57, %v1647_v16 }
 0x266   : > { %1856 = vst [vmem:[%s3303_s30 + $0x50] sm:$0xff] %v1844_v21  ;;  %v1845_v28 = vadd.f32 %v1833_v42, %v1754_v43 }
 0x267   : > { %1854 = vst [vmem:[%s3303_s30 + $0x40] sm:$0xff] %v1842_v22  ;;  %v1843_v8 = vadd.f32 %v1831_v49, %v1752_v27 }
 0x268   : > { %1857 = vst [vmem:[%s3303_s30 + $0x58] sm:$0xff] %v1845_v28 }
 0x269   : > { %1855 = vst [vmem:[%s3303_s30 + $0x48] sm:$0xff] %v1843_v8 }
 0x26a   : > { %2630 = shalt.err (!%p2627_p3)
}
 0x26b   : > { %s2631_s15 = scalar_lea.hbm %s3329_s9, 1536  ;;  %s2635_s23 = scalar_lea.hbm %s3384_s5, 3072 }
 0x26c   : > { %p2632_p4 = scmp.ne.s32.totalorder %s3329_s9, %s2631_s15  ;;  %p2636_p9 = scmp.lt.u32.totalorder %s3329_s9, %s3384_s5 }
 0x26d   : > { %p2637_p10 = scmp.lt.u32.totalorder %s2635_s23, %s2631_s15  ;;  %p2639_p12 = scmp.lt.u32.totalorder %s2631_s15, %s3329_s9 }
 0x26e   : > { %p2633_p7 = pnand %p2632_p4, %p2753_p5 }
 0x26f   : > { %p2638_p11 = por %p2637_p10, %p2636_p9 }
 0x270   : > { %p2634_p8 = pneg %p2633_p7 }
 0x271   : > { %p2640_p13 = por %p2639_p12, %p2638_p11 }
 0x273   : > { %p2641_p0 = pnand %p2640_p13, %p2634_p8 }
 0x275   : > { %2644 = shalt.err (!%p2641_p0)
}
 0x276   : > { %s2683_s30 = smov 128   ;;  %s2684_s6 = smov 8  }
 0x277   : > { %2549 = dma.vmem_to_hbm [thread:$0]  (%p2753_p5), %s3331_s7, 1536, %s3329_s9, %s3338_s10, %s2683_s30, %s2683_s30, %s2684_s6  }
 0x278 PF: > { %p2555_p1 = scmp.ge.s32.totalorder %s2679_s21, 2  ;;  %s1887_s22 = sand.u32 1, %s2667_s18  }
 0x279   : > { %s1888_s8 = scalar_lea.sflag [#allocation3], %s1887_s22 }
 0x27a   : > { %p2552_p2 = pnand %p2555_p1, %p2757_p6 }
 0x27c   : > { %2662 = dma.done.wait (!%p2552_p2), %s1888_s8, 1536  }
 0x27d   : > { %2664 = vsyncadd (!%p2552_p2), %s1888_s8, 4294965760  ;;  %p15_p3 = scmp.ge.s32.totalorder %s2740_s24, 4   ;;  %s3411_s18 = smov %s2671_s19 }
 0x27e   : > { %s3412_s19 = smov %s2675_s20  ;;  %s3413_s20 = smov %s2751_s27 }
 0x27f   : > { %s3414_s21 = smov %s2740_s24  ;;  %17 = sbr.rel (!%p15_p3) target bundleno = 3 (0x3), region = 81 }
 0x286   :  { %1893 = vsyncpa [#allocation3], 1 }
 0x287   :  { %1895 = vsyncpa [#allocation3 + $0x1], 1 }

</bundles_post_ra>
